<compile_context>
chip_gen: v7x
topology: tpu7x:2x2x1
jax: 0.10.0
libtpu: 0.0.40
codegen_flags: <defaults>
</compile_context>

<pallas_src>
import functools

import jax
import jax.numpy as jnp
from jax.experimental import pallas as pl
from jax.experimental.pallas import tpu as pltpu

_LANES = 128


# ----------------------------------------------------------------------------
# Synthetic parameters (canonical PyTorch / DGL layouts)
# ----------------------------------------------------------------------------
def init_params(key, feats):
    f = feats
    H = f * f
    In = (f + 1) * f * 3
    ks = jax.random.split(key, 12)

    def rnd(k, shape, scale=0.3):
        return scale * jax.random.normal(k, shape, jnp.float32)

    return {
        # DGL GATConv(f, 1, num_heads=f): fc.weight (heads*out, in) = (f, f),
        # attn_l / attn_r (1, heads, out) = (1, f, 1), bias (heads*out,) = (f,)
        "fgat_fc": rnd(ks[0], (f, f)),
        "fgat_al": rnd(ks[1], (1, f, 1)),
        "fgat_ar": rnd(ks[2], (1, f, 1)),
        "fgat_b": rnd(ks[3], (f,), 0.05),
        "tgat_fc": rnd(ks[4], (f, f)),
        "tgat_al": rnd(ks[5], (1, f, 1)),
        "tgat_ar": rnd(ks[6], (1, f, 1)),
        "tgat_b": rnd(ks[7], (f,), 0.05),
        # nn.GRU(In, H, 1): weight_ih_l0 (3H, In), weight_hh_l0 (3H, H),
        # bias_ih_l0 (3H,), bias_hh_l0 (3H,)   -- gate order [r, z, n]
        "gru_wih": rnd(ks[8], (3 * H, In), 0.2),
        "gru_whh": rnd(ks[9], (3 * H, H), 0.2),
        "gru_bih": rnd(ks[10], (3 * H,), 0.05),
        "gru_bhh": rnd(ks[11], (3 * H,), 0.05),
    }


def _pad128(x):
    return jnp.pad(x.astype(jnp.float32), ((0, 0), (0, _LANES - x.shape[1])))


def pack_params(params, feats):
    """Wrapper-side plumbing: merge/regroup both GATConvs and the whole GRU
    into one static 128-lane-wide f32 slab (the dynamic rows are prepended per
    call in the forward wrapper so the kernel sees a single input DMA)."""
    f = feats
    n = f + 1
    H = f * f
    In = n * f * 3

    # --- merged GAT params: block-diagonal fc + lane-concatenated al/ar/bias ---
    fcb = jnp.zeros((2 * f, 2 * f), jnp.float32)
    fcb = fcb.at[0:f, 0:f].set(params["fgat_fc"].T)          # z = nodes @ fc.T
    fcb = fcb.at[f:, f:].set(params["tgat_fc"].T)
    al = jnp.concatenate([params["fgat_al"].reshape(1, f),
                          params["tgat_al"].reshape(1, f)], axis=1)
    ar = jnp.concatenate([params["fgat_ar"].reshape(1, f),
                          params["tgat_ar"].reshape(1, f)], axis=1)
    gb = jnp.concatenate([params["fgat_b"].reshape(1, f),
                          params["tgat_b"].reshape(1, f)], axis=1)
    gat_rows = jnp.concatenate([fcb, al, ar, gb], axis=0)     # (2f+3, 2f)

    # --- fused GRU weight: g = [x | h] @ W_comb + b, cols = [r | z | n_i | n_h]
    # PyTorch flattens the GRU input as [node, head, component]; the kernel
    # builds per-node rows as [component, head].  Fold that reorder into a
    # column permutation of W_ih here (zero numeric change).
    perm = jnp.transpose(jnp.arange(In).reshape(n, f, 3), (0, 2, 1)).reshape(-1)
    w_ih = params["gru_wih"][:, perm].T                       # (In, 3H), kernel row order
    w_hh = params["gru_whh"].T                                # (H, 3H)
    wcomb = jnp.zeros((In + H, 4 * H), jnp.float32)
    wcomb = wcomb.at[:In, 0:2 * H].set(w_ih[:, 0:2 * H])
    wcomb = wcomb.at[In:, 0:2 * H].set(w_hh[:, 0:2 * H])
    wcomb = wcomb.at[:In, 2 * H:3 * H].set(w_ih[:, 2 * H:3 * H])
    wcomb = wcomb.at[In:, 3 * H:4 * H].set(w_hh[:, 2 * H:3 * H])
    bcomb = jnp.concatenate(
        [params["gru_bih"][0:2 * H] + params["gru_bhh"][0:2 * H],   # r,z biases pre-added
         params["gru_bih"][2 * H:3 * H],                            # n-gate input bias
         params["gru_bhh"][2 * H:3 * H]]).reshape(1, 4 * H)         # n-gate hidden bias
    gru_rows = jnp.concatenate([wcomb, bcomb], axis=0)        # (In+H+1, 4H)

    return jnp.concatenate([_pad128(gat_rows), _pad128(gru_rows)], axis=0)


# ----------------------------------------------------------------------------
# The fused Pallas kernel: merged GATConv pass + fused single-step GRU cell
# ----------------------------------------------------------------------------
def mtad_gat_kernel(slab_ref, out_ref, *, feats):
    f = feats
    n = f + 1            # nodes in the star graph
    f2 = 2 * f
    H = f * f            # GRU hidden size
    In = n * 3 * f       # GRU input size
    H4 = 4 * H
    bf = jnp.bfloat16

    # --- static row offsets inside the packed slab ---
    r_nodes = 0                      # (n, 2f)   [data_r | data_t]
    r_hid = n                        # (1, H)    previous hidden
    r_gfc = n + 1                    # (2f, 2f)  block-diag GAT fc
    r_gal = r_gfc + f2               # (1, 2f)   attn_l (both GATs)
    r_gar = r_gal + 1                # (1, 2f)   attn_r
    r_gb = r_gar + 1                 # (1, 2f)   bias
    r_gw = r_gb + 1                  # (In+H, 4H) fused GRU weight
    r_gbias = r_gw + In + H          # (1, 4H)   fused GRU bias

    nodes = slab_ref[r_nodes:r_nodes + n, 0:f2]          # (n, 2f) f32
    h_prev = slab_ref[r_hid:r_hid + 1, 0:H]              # (1, H)  f32

    # ---- merged GATConv (feature + time) over the star graph; heads = lanes --
    w_fc = slab_ref[r_gfc:r_gfc + f2, 0:f2]
    al = slab_ref[r_gal:r_gal + 1, 0:f2]
    ar = slab_ref[r_gar:r_gar + 1, 0:f2]
    gbias = slab_ref[r_gb:r_gb + 1, 0:f2]

    z = jnp.dot(nodes.astype(bf), w_fc.astype(bf),
                preferred_element_type=jnp.float32)       # (n, 2f)
    e = z * al + z[0:1, :] * ar                           # edge logits i -> 0
    e = jnp.where(e >= 0.0, e, 0.2 * e)                   # LeakyReLU(0.2)
    e = e - jnp.max(e, axis=0, keepdims=True)
    p = jnp.exp(e)
    a = p / jnp.sum(p, axis=0, keepdims=True)             # softmax over source nodes
    out0 = jnp.sum(a * z, axis=0, keepdims=True)          # (1, 2f): node-0 aggregation
    # nodes 1..f only have their self-loop -> softmax weight 1 -> output = z
    row_id = jax.lax.broadcasted_iota(jnp.int32, (n, f2), 0)
    gat_out = jnp.where(row_id == 0, out0, z) + gbias     # (n, 2f) = [feat_r | time_r]

    # ---- GRU input per node: [data | feat | time] (no (1, In) relayout) ----
    xcat = jnp.concatenate([nodes[:, 0:f], gat_out], axis=1)     # (n, 3f)

    # ---- fused single-step GRU: g = [x | h] @ W_comb + b ----
    acc = slab_ref[r_gbias:r_gbias + 1, 0:H4]             # (1, 4H) fused bias
    for i in range(n):   # unrolled: per-node row block of W_comb
        w_i = slab_ref[r_gw + i * 3 * f:r_gw + (i + 1) * 3 * f, 0:H4]
        acc = acc + jnp.dot(xcat[i:i + 1, :].astype(bf), w_i.astype(bf),
                            preferred_element_type=jnp.float32)
    w_h = slab_ref[r_gw + In:r_gw + In + H, 0:H4]
    acc = acc + jnp.dot(h_prev.astype(bf), w_h.astype(bf),
                        preferred_element_type=jnp.float32)

    r_gate = jax.nn.sigmoid(acc[:, 0:H])
    z_gate = jax.nn.sigmoid(acc[:, H:2 * H])
    n_gate = jnp.tanh(acc[:, 2 * H:3 * H] + r_gate * acc[:, 3 * H:4 * H])
    out_ref[...] = (1.0 - z_gate) * n_gate + z_gate * h_prev


# ----------------------------------------------------------------------------
# MTAD_GAT.forward
# ----------------------------------------------------------------------------
def mtad_gat_forward(data, hidden, static_slab, *, feats, key=None):
    f = feats
    H = f * f
    # Reference: `hidden = torch.rand(1,1,n_hidden) if hidden is not None else hidden`
    # i.e. a provided hidden is replaced by a fresh random one; None -> zero state.
    if hidden is not None:
        hidden = jax.random.uniform(key, (1, 1, H), jnp.float32)
    h0 = jnp.zeros((1, H), jnp.float32) if hidden is None else hidden.reshape(1, H)

    d = data.reshape(f, f).astype(jnp.float32)   # data.view(n_window, n_feats); n_window == feats
    zrow = jnp.zeros((1, f), jnp.float32)
    nodes = jnp.concatenate(
        [jnp.concatenate([zrow, d], axis=0),     # data_r
         jnp.concatenate([zrow, d.T], axis=0)],  # data_t
        axis=1)                                  # (f+1, 2f)

    # Single packed f32 slab: [dynamic rows ; static param rows] -> one DMA.
    slab = jnp.concatenate([_pad128(nodes), _pad128(h0), static_slab], axis=0)

    kernel = functools.partial(mtad_gat_kernel, feats=f)
    vmem = pl.BlockSpec(memory_space=pltpu.MemorySpace.VMEM)
    h_new = pl.pallas_call(
        kernel,
        out_shape=jax.ShapeDtypeStruct((1, H), jnp.float32),
        in_specs=[vmem],
        out_specs=vmem,
    )(slab)
    return h_new.reshape(-1), h_new.reshape(1, 1, H)


# ----------------------------------------------------------------------------
# Plain-JAX reference (canonical layouts, PyTorch flatten order) for validation
# ----------------------------------------------------------------------------
def forward_reference(data, h0, params, feats):
    f = feats
    H = f * f
    d = data.reshape(f, f)

    def gat(h_nodes, fc, al, ar, b):
        z = h_nodes @ fc.T                           # (f+1, f)
        el = z * al.reshape(1, f)
        er = z * ar.reshape(1, f)
        e = el + er[0:1]
        e = jnp.where(e >= 0, e, 0.2 * e)
        a = jax.nn.softmax(e, axis=0)
        out0 = (a * z).sum(axis=0, keepdims=True)
        return jnp.concatenate([out0, z[1:]], axis=0) + b.reshape(1, f)

    zrow = jnp.zeros((1, f), jnp.float32)
    data_r = jnp.concatenate([zrow, d], axis=0)
    data_t = jnp.concatenate([zrow, d.T], axis=0)
    feat_r = gat(data_r, params["fgat_fc"], params["fgat_al"], params["fgat_ar"], params["fgat_b"])
    time_r = gat(data_t, params["tgat_fc"], params["tgat_al"], params["tgat_ar"], params["tgat_b"])

    x = jnp.stack([data_r, feat_r, time_r], axis=2).reshape(1, -1)   # PyTorch flatten order
    gi = x @ params["gru_wih"].T + params["gru_bih"]
    gh = h0 @ params["gru_whh"].T + params["gru_bhh"]
    r = jax.nn.sigmoid(gi[:, :H] + gh[:, :H])
    zt = jax.nn.sigmoid(gi[:, H:2 * H] + gh[:, H:2 * H])
    nt = jnp.tanh(gi[:, 2 * H:] + r * gh[:, 2 * H:])
    return (1.0 - zt) * nt + zt * h0


if __name__ == "__main__":
    FEATS = 4                      # n_window == n_feats == 4, n_hidden = 16
    H = FEATS * FEATS

    key = jax.random.PRNGKey(0)
    k_param, k_data, k_hidden = jax.random.split(key, 3)

    params = init_params(k_param, FEATS)
    static_slab = pack_params(params, FEATS)

    data = jax.random.uniform(k_data, (FEATS * FEATS,), jnp.float32)   # flat window fed to .view()
    hidden_in = jnp.zeros((1, 1, H), jnp.float32)                      # non-None -> replaced by rand

    fwd = jax.jit(functools.partial(mtad_gat_forward, feats=FEATS))

    # --- path 1: hidden provided (regenerated with uniform noise) ---
    x_out, h_out = fwd(data, hidden_in, static_slab, key=k_hidden)
    jax.block_until_ready((x_out, h_out))
    assert x_out.shape == (H,) and h_out.shape == (1, 1, H)
    assert bool(jnp.all(jnp.isfinite(x_out)))

    h0_ref = jax.random.uniform(k_hidden, (1, 1, H), jnp.float32).reshape(1, H)
    ref = forward_reference(data, h0_ref, params, FEATS).reshape(-1)
    assert bool(jnp.allclose(x_out, ref, rtol=1e-2, atol=1e-2)), (x_out, ref)
    assert bool(jnp.allclose(h_out.reshape(-1), ref, rtol=1e-2, atol=1e-2))

    # --- path 2: hidden is None -> zero initial state ---
    x0_out, h0_out = fwd(data, None, static_slab, key=k_hidden)
    jax.block_until_ready((x0_out, h0_out))
    ref0 = forward_reference(data, jnp.zeros((1, H), jnp.float32), params, FEATS).reshape(-1)
    assert bool(jnp.allclose(x0_out, ref0, rtol=1e-2, atol=1e-2)), (x0_out, ref0)

    print("KERNEL_OK")
</pallas_src>

<mosaic_0001>
module attributes {stable_mosaic.version = 11 : i64} {
  func.func @mtad_gat_kernel(%arg0: memref<94x128xf32, #tpu.memory_space<vmem>>, %arg1: memref<1x16xf32, #tpu.memory_space<vmem>>) attributes {dimension_semantics = [], scalar_prefetch = 0 : i64, scratch_operands = 0 : i64, tpu.core_type = #tpu.core_type<tc>} {
    %c0 = arith.constant 0 : index
    %c0_0 = arith.constant 0 : index
    %0 = vector.load %arg0[%c0, %c0_0] : memref<94x128xf32, #tpu.memory_space<vmem>>, vector<5x8xf32>
    %c5 = arith.constant 5 : index
    %c0_1 = arith.constant 0 : index
    %1 = vector.load %arg0[%c5, %c0_1] : memref<94x128xf32, #tpu.memory_space<vmem>>, vector<1x16xf32>
    %c6 = arith.constant 6 : index
    %c0_2 = arith.constant 0 : index
    %2 = vector.load %arg0[%c6, %c0_2] : memref<94x128xf32, #tpu.memory_space<vmem>>, vector<8x8xf32>
    %c14 = arith.constant 14 : index
    %c0_3 = arith.constant 0 : index
    %3 = vector.load %arg0[%c14, %c0_3] : memref<94x128xf32, #tpu.memory_space<vmem>>, vector<1x8xf32>
    %c15 = arith.constant 15 : index
    %c0_4 = arith.constant 0 : index
    %4 = vector.load %arg0[%c15, %c0_4] : memref<94x128xf32, #tpu.memory_space<vmem>>, vector<1x8xf32>
    %c16 = arith.constant 16 : index
    %c0_5 = arith.constant 0 : index
    %5 = vector.load %arg0[%c16, %c0_5] : memref<94x128xf32, #tpu.memory_space<vmem>>, vector<1x8xf32>
    %6 = arith.truncf %0 : vector<5x8xf32> to vector<5x8xbf16>
    %7 = arith.truncf %2 : vector<8x8xf32> to vector<8x8xbf16>
    %cst = arith.constant dense<0.000000e+00> : vector<5x8xf32>
    %8 = tpu.matmul %6, %7, %cst {dimension_numbers = #tpu.dot_dimension_numbers<[1], [0], [0], [1], [0, 0, 1, 1], [], []>} : vector<5x8xbf16>, vector<8x8xbf16>, vector<5x8xf32> -> vector<5x8xf32>
    %9 = vector.broadcast %3 : vector<1x8xf32> to vector<5x8xf32>
    %10 = arith.mulf %8, %9 : vector<5x8xf32>
    %11 = vector.extract_strided_slice %8 {offsets = [0, 0], sizes = [1, 8], strides = [1, 1]} : vector<5x8xf32> to vector<1x8xf32>
    %12 = arith.mulf %11, %4 : vector<1x8xf32>
    %13 = vector.broadcast %12 : vector<1x8xf32> to vector<5x8xf32>
    %14 = arith.addf %10, %13 : vector<5x8xf32>
    %cst_6 = arith.constant 0.000000e+00 : f32
    %15 = vector.broadcast %cst_6 : f32 to vector<5x8xf32>
    %16 = arith.cmpf oge, %14, %15 : vector<5x8xf32>
    %cst_7 = arith.constant 2.000000e-01 : f32
    %17 = vector.broadcast %cst_7 : f32 to vector<5x8xf32>
    %18 = arith.mulf %17, %14 : vector<5x8xf32>
    %19 = arith.select %16, %14, %18 : vector<5x8xi1>, vector<5x8xf32>
    %cst_8 = arith.constant dense<0xFF800000> : vector<8xf32>
    %20 = vector.multi_reduction <maximumf>, %19, %cst_8 [0] : vector<5x8xf32> to vector<8xf32>
    %21 = vector.shape_cast %20 : vector<8xf32> to vector<1x8xf32>
    %22 = vector.broadcast %21 : vector<1x8xf32> to vector<5x8xf32>
    %23 = arith.subf %19, %22 : vector<5x8xf32>
    %24 = math.exp %23 : vector<5x8xf32>
    %cst_9 = arith.constant dense<0.000000e+00> : vector<8xf32>
    %25 = vector.multi_reduction <add>, %24, %cst_9 [0] : vector<5x8xf32> to vector<8xf32>
    %26 = vector.shape_cast %25 : vector<8xf32> to vector<1x8xf32>
    %27 = vector.broadcast %26 : vector<1x8xf32> to vector<5x8xf32>
    %28 = arith.divf %24, %27 : vector<5x8xf32>
    %29 = arith.mulf %28, %8 : vector<5x8xf32>
    %cst_10 = arith.constant dense<0.000000e+00> : vector<8xf32>
    %30 = vector.multi_reduction <add>, %29, %cst_10 [0] : vector<5x8xf32> to vector<8xf32>
    %31 = vector.shape_cast %30 : vector<8xf32> to vector<1x8xf32>
    %32 = tpu.iota {dimensions = array<i32: 0>} : vector<5x8xi32>
    %c0_i32 = arith.constant 0 : i32
    %33 = vector.broadcast %c0_i32 : i32 to vector<5x8xi32>
    %34 = arith.cmpi eq, %32, %33 : vector<5x8xi32>
    %35 = vector.shape_cast %31 : vector<1x8xf32> to vector<1x8xf32>
    %36 = vector.broadcast %35 : vector<1x8xf32> to vector<5x8xf32>
    %37 = arith.select %34, %36, %8 : vector<5x8xi1>, vector<5x8xf32>
    %38 = vector.broadcast %5 : vector<1x8xf32> to vector<5x8xf32>
    %39 = arith.addf %37, %38 : vector<5x8xf32>
    %40 = vector.extract_strided_slice %0 {offsets = [0, 0], sizes = [5, 4], strides = [1, 1]} : vector<5x8xf32> to vector<5x4xf32>
    %41 = tpu.concatenate %40, %39 in 1 : vector<5x4xf32>, vector<5x8xf32> -> vector<5x12xf32>
    %c93 = arith.constant 93 : index
    %c0_11 = arith.constant 0 : index
    %42 = vector.load %arg0[%c93, %c0_11] : memref<94x128xf32, #tpu.memory_space<vmem>>, vector<1x64xf32>
    %c17 = arith.constant 17 : index
    %c0_12 = arith.constant 0 : index
    %43 = vector.load %arg0[%c17, %c0_12] : memref<94x128xf32, #tpu.memory_space<vmem>>, vector<12x64xf32>
    %44 = vector.extract_strided_slice %41 {offsets = [0, 0], sizes = [1, 12], strides = [1, 1]} : vector<5x12xf32> to vector<1x12xf32>
    %45 = arith.truncf %44 : vector<1x12xf32> to vector<1x12xbf16>
    %46 = arith.truncf %43 : vector<12x64xf32> to vector<12x64xbf16>
    %cst_13 = arith.constant dense<0.000000e+00> : vector<1x64xf32>
    %47 = tpu.matmul %45, %46, %cst_13 {dimension_numbers = #tpu.dot_dimension_numbers<[1], [0], [0], [1], [0, 0, 1, 1], [], []>} : vector<1x12xbf16>, vector<12x64xbf16>, vector<1x64xf32> -> vector<1x64xf32>
    %48 = arith.addf %42, %47 : vector<1x64xf32>
    %c29 = arith.constant 29 : index
    %c0_14 = arith.constant 0 : index
    %49 = vector.load %arg0[%c29, %c0_14] : memref<94x128xf32, #tpu.memory_space<vmem>>, vector<12x64xf32>
    %50 = vector.extract_strided_slice %41 {offsets = [1, 0], sizes = [1, 12], strides = [1, 1]} : vector<5x12xf32> to vector<1x12xf32>
    %51 = arith.truncf %50 : vector<1x12xf32> to vector<1x12xbf16>
    %52 = arith.truncf %49 : vector<12x64xf32> to vector<12x64xbf16>
    %cst_15 = arith.constant dense<0.000000e+00> : vector<1x64xf32>
    %53 = tpu.matmul %51, %52, %cst_15 {dimension_numbers = #tpu.dot_dimension_numbers<[1], [0], [0], [1], [0, 0, 1, 1], [], []>} : vector<1x12xbf16>, vector<12x64xbf16>, vector<1x64xf32> -> vector<1x64xf32>
    %54 = arith.addf %48, %53 : vector<1x64xf32>
    %c41 = arith.constant 41 : index
    %c0_16 = arith.constant 0 : index
    %55 = vector.load %arg0[%c41, %c0_16] : memref<94x128xf32, #tpu.memory_space<vmem>>, vector<12x64xf32>
    %56 = vector.extract_strided_slice %41 {offsets = [2, 0], sizes = [1, 12], strides = [1, 1]} : vector<5x12xf32> to vector<1x12xf32>
    %57 = arith.truncf %56 : vector<1x12xf32> to vector<1x12xbf16>
    %58 = arith.truncf %55 : vector<12x64xf32> to vector<12x64xbf16>
    %cst_17 = arith.constant dense<0.000000e+00> : vector<1x64xf32>
    %59 = tpu.matmul %57, %58, %cst_17 {dimension_numbers = #tpu.dot_dimension_numbers<[1], [0], [0], [1], [0, 0, 1, 1], [], []>} : vector<1x12xbf16>, vector<12x64xbf16>, vector<1x64xf32> -> vector<1x64xf32>
    %60 = arith.addf %54, %59 : vector<1x64xf32>
    %c53 = arith.constant 53 : index
    %c0_18 = arith.constant 0 : index
    %61 = vector.load %arg0[%c53, %c0_18] : memref<94x128xf32, #tpu.memory_space<vmem>>, vector<12x64xf32>
    %62 = vector.extract_strided_slice %41 {offsets = [3, 0], sizes = [1, 12], strides = [1, 1]} : vector<5x12xf32> to vector<1x12xf32>
    %63 = arith.truncf %62 : vector<1x12xf32> to vector<1x12xbf16>
    %64 = arith.truncf %61 : vector<12x64xf32> to vector<12x64xbf16>
    %cst_19 = arith.constant dense<0.000000e+00> : vector<1x64xf32>
    %65 = tpu.matmul %63, %64, %cst_19 {dimension_numbers = #tpu.dot_dimension_numbers<[1], [0], [0], [1], [0, 0, 1, 1], [], []>} : vector<1x12xbf16>, vector<12x64xbf16>, vector<1x64xf32> -> vector<1x64xf32>
    %66 = arith.addf %60, %65 : vector<1x64xf32>
    %c65 = arith.constant 65 : index
    %c0_20 = arith.constant 0 : index
    %67 = vector.load %arg0[%c65, %c0_20] : memref<94x128xf32, #tpu.memory_space<vmem>>, vector<12x64xf32>
    %68 = vector.extract_strided_slice %41 {offsets = [4, 0], sizes = [1, 12], strides = [1, 1]} : vector<5x12xf32> to vector<1x12xf32>
    %69 = arith.truncf %68 : vector<1x12xf32> to vector<1x12xbf16>
    %70 = arith.truncf %67 : vector<12x64xf32> to vector<12x64xbf16>
    %cst_21 = arith.constant dense<0.000000e+00> : vector<1x64xf32>
    %71 = tpu.matmul %69, %70, %cst_21 {dimension_numbers = #tpu.dot_dimension_numbers<[1], [0], [0], [1], [0, 0, 1, 1], [], []>} : vector<1x12xbf16>, vector<12x64xbf16>, vector<1x64xf32> -> vector<1x64xf32>
    %72 = arith.addf %66, %71 : vector<1x64xf32>
    %c77 = arith.constant 77 : index
    %c0_22 = arith.constant 0 : index
    %73 = vector.load %arg0[%c77, %c0_22] : memref<94x128xf32, #tpu.memory_space<vmem>>, vector<16x64xf32>
    %74 = arith.truncf %1 : vector<1x16xf32> to vector<1x16xbf16>
    %75 = arith.truncf %73 : vector<16x64xf32> to vector<16x64xbf16>
    %cst_23 = arith.constant dense<0.000000e+00> : vector<1x64xf32>
    %76 = tpu.matmul %74, %75, %cst_23 {dimension_numbers = #tpu.dot_dimension_numbers<[1], [0], [0], [1], [0, 0, 1, 1], [], []>} : vector<1x16xbf16>, vector<16x64xbf16>, vector<1x64xf32> -> vector<1x64xf32>
    %77 = arith.addf %72, %76 : vector<1x64xf32>
    %78 = vector.extract_strided_slice %77 {offsets = [0, 0], sizes = [1, 16], strides = [1, 1]} : vector<1x64xf32> to vector<1x16xf32>
    %79 = arith.negf %78 : vector<1x16xf32>
    %80 = math.exp %79 : vector<1x16xf32>
    %cst_24 = arith.constant 1.000000e+00 : f32
    %81 = vector.broadcast %cst_24 : f32 to vector<1x16xf32>
    %82 = arith.addf %81, %80 : vector<1x16xf32>
    %83 = arith.divf %81, %82 : vector<1x16xf32>
    %84 = vector.extract_strided_slice %77 {offsets = [0, 16], sizes = [1, 16], strides = [1, 1]} : vector<1x64xf32> to vector<1x16xf32>
    %85 = arith.negf %84 : vector<1x16xf32>
    %86 = math.exp %85 : vector<1x16xf32>
    %cst_25 = arith.constant 1.000000e+00 : f32
    %87 = vector.broadcast %cst_25 : f32 to vector<1x16xf32>
    %88 = arith.addf %87, %86 : vector<1x16xf32>
    %89 = arith.divf %87, %88 : vector<1x16xf32>
    %90 = vector.extract_strided_slice %77 {offsets = [0, 32], sizes = [1, 16], strides = [1, 1]} : vector<1x64xf32> to vector<1x16xf32>
    %91 = vector.extract_strided_slice %77 {offsets = [0, 48], sizes = [1, 16], strides = [1, 1]} : vector<1x64xf32> to vector<1x16xf32>
    %92 = arith.mulf %83, %91 : vector<1x16xf32>
    %93 = arith.addf %90, %92 : vector<1x16xf32>
    %94 = math.tanh %93 : vector<1x16xf32>
    %cst_26 = arith.constant 1.000000e+00 : f32
    %95 = vector.broadcast %cst_26 : f32 to vector<1x16xf32>
    %96 = arith.subf %95, %89 : vector<1x16xf32>
    %97 = arith.mulf %96, %94 : vector<1x16xf32>
    %98 = arith.mulf %89, %1 : vector<1x16xf32>
    %99 = arith.addf %97, %98 : vector<1x16xf32>
    %c0_27 = arith.constant 0 : index
    %c0_28 = arith.constant 0 : index
    %100 = vector.load %arg1[%c0_27, %c0_28] : memref<1x16xf32, #tpu.memory_space<vmem>>, vector<1x16xf32>
    tpu.vector_store %arg1[%c0_27, %c0_28], %99 {strides = array<i32>} : memref<1x16xf32, #tpu.memory_space<vmem>>, vector<1x16xf32>,
    return
  }
}

</mosaic_0001>

<bundles_post_ra>
// kernel: mtad_gat_forward.1
= control target key start
LH: loop header
LB: loop body
LE: loop exit
PB: predicated region body
PF: predicated region fallthrough
CT: control target
= control target key end

     0   :  { %v571_v0 = vmov 0.0   ;;  %vm21_vm0 = vcmask 1043456   ;;  %vm572_vm1 = vmmov 0   ;;  %vm17_vm2 = vcmask 64512   ;;  %s573_s24 = smov 4   ;;  %s574_s16 = smov 80   ;;  %s687_s0 = inlined_call_operand.vmem [shape: f32[94,128], index: 0, kind: input, shape index: {}]   ;;  %s688_s1 = inlined_call_operand.vmem [shape: f32[1,16], index: 1, kind: output, shape index: {}]  }
   0x1   :  { %494 = vmatprep.subr.bf16.mxu0 %v571_v0  ;;  %v11_v1 = vld [vmem:[%s687_s0 + $0x6] sm:$0xff]  ;;  %496 = vmatprep.mubr.msk.bf16.mxu0 %vm572_vm1, %v571_v0  ;;  %v597_v2 = vld [vmem:[%s687_s0] sm:$0x1f]  ;;  %v71_v6 = vlaneseq  ;;  %v13_v8 = vld [vmem:[%s687_s0 + $0xf] sm:$0x1]  ;;  %vm79_vm4 = vcmask 61440  }
   0x2   :  { %v16_v3 = vpack.c.bf16 %v11_v1, %v11_v1  ;;  %512 = vmatprep.subr.bf16.mxu1 %v571_v0  ;;  %514 = vmatprep.mubr.msk.bf16.mxu1 %vm572_vm1, %v571_v0  ;;  %v15_v5 = vpack.c.bf16 %v597_v2, %v597_v2  ;;  %v471_v10 = vld [vmem:[%s687_s0 + $0xe] ss:$0 sm:$0xff]  ;;  %v123_v41 = vld [vmem:[%s687_s0 + $0x11] sm:$0xff]  ;;  %v124_v42 = vld [vmem:[%s687_s0 + $0x19] sm:$0xf]  ;;  %vm131_vm5 = vcmask 1045504  }
   0x3   :  { %v72_v7 = vshrl.u32 %v71_v6, 7  ;;  %v126_v44 = vpack.c.bf16 %v124_v42, %v123_v41  ;;  %v228_v46 = vld [vmem:[%s687_s0 + $0x29] sm:$0xff]  ;;  %v229_v47 = vld [vmem:[%s687_s0 + $0x31] sm:$0xf]  ;;  %v176_v59 = vld [vmem:[%s687_s0 + $0x1d] sm:$0xff]  ;;  %vm120_vm7 = vcmask 31744  }
   0x4   :  { %v23_v4 = vsel %vm21_vm0, %v16_v3, 0  ;;  %v230_v49 = vpack.c.bf16 %v229_v47, %v228_v46  ;;  %v472_v55 = vld [vmem:[%s687_s0 + $0x10] ss:$0 sm:$0xff]  ;;  %v177_v60 = vld [vmem:[%s687_s0 + $0x25] sm:$0xf]  ;;  %v280_v61 = vld [vmem:[%s687_s0 + $0x35] sm:$0xff] }
   0x5   :  { %495 = vmatpush3.bf16.msra.mxu0 %v23_v4  ;;  %v73_v9 = vsub.s32 0, %v72_v7  ;;  %v133_v48 = vsel %vm131_vm5, %v126_v44, 0  ;;  %vm109_vm6 = vcmp.eq.s32.totalorder %v72_v7, 0  ;;  %v281_v62 = vld [vmem:[%s687_s0 + $0x3d] sm:$0xf]  ;;  %v178_v63 = vpack.c.bf16 %v177_v60, %v176_v59  ;;  %s575_s17 = smov 16  }
   0x6   :  { %500 = vmatprep.subr.bf16.mxu0 %v571_v0  ;;  %v237_v51 = vsel %vm131_vm5, %v230_v49, 0  ;;  %v282_v3 = vpack.c.bf16 %v281_v62, %v280_v61  ;;  %vm127_vm8 = vcmask 97280   ;;  %vm386_vm9 = vcmask 130048   ;;  %s576_s18 = smov 32  }
   0x7   :  { %513 = vmatpush3.bf16.msra.mxu1 %v237_v51  ;;  %v185_v6 = vsel %vm131_vm5, %v178_v63, 0  ;;  %vm464_vm10 = vcmask 122880  }
   0x8   :  { %497 = vmatmul.mubr.msk.bf16.vlgmr.msra.gmra.mrb[0].mxu0 %vm17_vm2, %v15_v5  ;;  %518 = vmatprep.subr.bf16.mxu1 %v571_v0 }
   0x9   :  { %502 = vmatprep.mubr.msk.bf16.mxu0 %vm572_vm1, %v571_v0  ;;  %501 = vmatpush3.bf16.msra.mxu0 %v133_v48 }
   0xa   :  { %506 = vmatprep.subr.bf16.mxu0 %v571_v0 }
  0xdb   :  { %v59_v11 = vpop.f32.mrb[0].mxu0 }
  0xdc   :  { %v70_v12 = vmul.f32 %v59_v11, %v13_v8  ;;  %v498_v13 = vpop.f32.mrb[1].mxu0  ;;  %v69_v15 = vmul.f32 %v471_v10, %v59_v11  ;;  %v288_v8 = vsel %vm131_vm5, %v282_v3, 0 }
  0xdd   :  { %v62_v14 = vpop.f32.mrb[2].mxu0 }
  0xde   :  { %v74_v16 = vrot.slane %v70_v12, %v73_v9  ;;  %v499_v17 = vpop.f32.mrb[3].mxu0  ;;  %v332_v9 = vld [vmem:[%s687_s0 + $0x49] sm:$0xf]  ;;  %v382_v14 = vld [vmem:[%s687_s0 + $0x4d] sm:$0xff] }
  0xe0   :  { %v75_v18 = vadd.f32 %v74_v16, %v69_v15  ;;  %v383_v15 = vld [vmem:[%s687_s0 + $0x55] sm:$0xff] }
  0xe1   :  { %v385_v16 = vpack.c.bf16 %v383_v15, %v382_v14 }
  0xe2   :  { %vm76_vm3 = vcmp.ge.f32.partialorder %v75_v18, 0.0  ;;  %v77_v19 = vmul.f32 0.2, %v75_v18 }
  0xe4   :  { %v78_v20 = vsel %vm76_vm3, %v75_v18, %v77_v19  ;;  %v10_v18 = vld [vmem:[%s687_s0 + $0x5] sm:$0x1] }
  0xe5   :  { %v80_v21 = vsel %vm79_vm4, %v78_v20, -inf  ;;  %v384_v19 = vpack.c.bf16 %v10_v18, %v10_v18 }
  0xe6   :  { %v81_v22 = vrot.slane %v80_v21, 4 }
  0xe8   :  { %v82_v23 = vmax.f32 %v80_v21, %v81_v22 }
  0xea   :  { %v83_v24 = vrot.slane %v82_v23, 2 }
  0xec   :  { %v84_v25 = vmax.f32 %v82_v23, %v83_v24  ;;  %v122_v24 = vld [vmem:[%s687_s0 + $0x5d] sm:$0x1] }
  0xee   :  { %v85_v26 = vrot.slane %v84_v25, 1 }
  0xf0   :  { %v86_v27 = vmax.f32 %v84_v25, %v85_v26 }
  0xf2   :  { %v87_v28 = vsub.f32 %v78_v20, %v86_v27 }
  0xf4   :  { %v88_v29 = vmul.f32 1.442695, %v87_v28 }
  0xf6   :  { %561 = vpow2.f32 %v88_v29 }
 0x100   :  { %v562_v30 = vpop.eup %561 }
 0x101   :  { %v90_v31 = vsel %vm79_vm4, %v562_v30, 0.0 }
 0x102   :  { %v91_v32 = vrot.slane %v90_v31, 4 }
 0x104   :  { %v92_v33 = vadd.f32 %v91_v32, %v90_v31 }
 0x106   :  { %v93_v34 = vrot.slane %v92_v33, 2 }
 0x108   :  { %v94_v35 = vadd.f32 %v93_v34, %v92_v33 }
 0x10a   :  { %v95_v36 = vrot.slane %v94_v35, 1 }
 0x10c   :  { %v96_v37 = vadd.f32 %v95_v36, %v94_v35 }
 0x10e   :  { %563 = vrcp.f32 %v96_v37 }
 0x118   :  { %v564_v38 = vpop.eup %563 }
 0x119   :  { %v98_v39 = vmul.f32 %v564_v38, %v562_v30 }
 0x11b   :  { %v99_v40 = vmul.f32 %v98_v39, %v59_v11 }
 0x11d   :  { %v100_v43 = vsel %vm79_vm4, %v99_v40, 0.0 }
 0x11e   :  { %v101_v45 = vrot.slane %v100_v43, 4 }
 0x120   :  { %v102_v50 = vadd.f32 %v101_v45, %v100_v43 }
 0x122   :  { %v103_v52 = vrot.slane %v102_v50, 2 }
 0x124   :  { %v104_v53 = vadd.f32 %v103_v52, %v102_v50 }
 0x126   :  { %v105_v54 = vrot.slane %v104_v53, 1 }
 0x128   :  { %v106_v56 = vadd.f32 %v105_v54, %v104_v53 }
 0x12a   :  { %v110_v57 = vsel %vm109_vm6, %v106_v56, %v59_v11 }
 0x12b   :  { %v115_v58 = vadd.f32 %v472_v55, %v110_v57 }
 0x12d   :  { %117 = vrot.lane.b32.xlu0 %v115_v58, %s573_s24 }
 0x19f   :  { %v118_v1 = vpop.permute.xlu0 %117 }
 0x1a0   :  { %v121_v4 = vsel %vm120_vm7, %v597_v2, %v118_v1  ;;  %v331_v2 = vld [vmem:[%s687_s0 + $0x41] sm:$0xff]  ;;  %s577_s0 = smov 112  }
 0x1a1   :  { %v125_v5 = vpack.c.bf16 %v121_v4, %v121_v4  ;;  %v333_v11 = vpack.c.bf16 %v332_v9, %v331_v2 }
 0x1a3   :  { %503 = vmatmul.mubr.msk.bf16.vlgmr.msra.gmra.mrb[4].mxu0 %vm127_vm8, %v125_v5  ;;  %v232_v7 = vrot.slane %v125_v5, 1  ;;  %v179_v10 = vshrl.u32 %v125_v5, 16  ;;  %v339_v13 = vsel %vm131_vm5, %v333_v11, 0  ;;  %v334_v17 = vrot.slane %v125_v5, 2 }
 0x1a4   :  { %507 = vmatpush3.bf16.msra.mxu0 %v185_v6  ;;  %508 = vmatprep.mubr.msk.bf16.mxu0 %vm572_vm1, %v571_v0 }
 0x1a5   :  { %515 = vmatmul.mubr.msk.bf16.vlgmr.msra.gmra.mrb[0].mxu1 %vm127_vm8, %v232_v7  ;;  %v283_v12 = vrot.slane %v179_v10, 1 }
 0x1a6   :  { %519 = vmatpush3.bf16.msra.mxu1 %v288_v8  ;;  %520 = vmatprep.mubr.msk.bf16.mxu1 %vm572_vm1, %v571_v0 }
 0x1a7   :  { %524 = vmatprep.subr.bf16.mxu1 %v571_v0 }
 0x1af   :  { %509 = vmatmul.mubr.msk.bf16.vlgmr.msra.gmra.mrb[4].mxu0 %vm127_vm8, %v179_v10 }
 0x1b1   :  { %521 = vmatmul.mubr.msk.bf16.vlgmr.msra.gmra.mrb[0].mxu1 %vm127_vm8, %v283_v12 }
 0x1b2   :  { %525 = vmatpush3.bf16.msra.mxu1 %v339_v13  ;;  %526 = vmatprep.mubr.msk.bf16.mxu1 %vm572_vm1, %v571_v0 }
 0x1b3   :  { %530 = vmatprep.subr.bf16.mxu1 %v571_v0 }
 0x1bd   :  { %527 = vmatmul.mubr.msk.bf16.vlgmr.msra.gmra.mrb[0].mxu1 %vm127_vm8, %v334_v17 }
 0x1be   :  { %531 = vmatpush3.bf16.msra.mxu1 %v385_v16  ;;  %532 = vmatprep.mubr.msk.bf16.mxu1 %vm572_vm1, %v571_v0 }
 0x1c9   :  { %533 = vmatmul.mubr.msk.bf16.vlgmr.msra.gmra.mrb[0].mxu1 %vm386_vm9, %v384_v19 }
 0x282   :  { %v221_v20 = vpop.f32.mrb[4].mxu0 }
 0x283   :  { %v510_v21 = vpop.f32.mrb[5].mxu0  ;;  %v536_v25 = vadd.f32 %v221_v20, %v122_v24 }
 0x284   :  { %v224_v22 = vpop.f32.mrb[6].mxu0 }
 0x285   :  { %v511_v23 = vpop.f32.mrb[7].mxu0 }
 0x29c   :  { %v424_v26 = vpop.f32.mrb[0].mxu1 }
 0x29d   :  { %v537_v27 = vadd.f32 %v536_v25, %v424_v26  ;;  %v534_v28 = vpop.f32.mrb[1].mxu1 }
 0x29e   :  { %v427_v0 = vpop.f32.mrb[2].mxu1 }
 0x29f   :  { %v535_v29 = vpop.f32.mrb[3].mxu1  ;;  %438 = vrot.lane.b32.xlu0 %v537_v27, %s574_s16  ;;  %v479_v30 = vmul.f32 -1.442695, %v537_v27 }
 0x2a1   :  { %565 = vpow2.f32 %v479_v30 }
 0x2a3   :  { %455 = vrot.lane.b32.xlu0 %v10_v18, %s575_s17 }
 0x2ab   :  { %v566_v31 = vpop.eup %565 }
 0x2ac   :  { %v434_v32 = vadd.f32 1.0, %v566_v31 }
 0x2ae   :  { %567 = vrcp.f32 %v434_v32 }
 0x2b8   :  { %v568_v33 = vpop.eup %567 }
 0x2b9   :  { %v448_v40 = vsub.f32 1.0, %v568_v33 }
 0x311   :  { %v439_v34 = vpop.permute.xlu0 %438 }
 0x312   :  { %v441_v35 = vmul.f32 %v568_v33, %v439_v34 }
 0x314   :  { %443 = vrot.lane.b32.xlu1 %v441_v35, %s576_s18 }
 0x315   :  { %v456_v39 = vpop.permute.xlu0 %455 }
 0x316   :  { %v458_v42 = vmul.f32 %v568_v33, %v456_v39 }
 0x386   :  { %v444_v36 = vpop.permute.xlu1 %443 }
 0x387   :  { %v446_v37 = vadd.f32 %v537_v27, %v444_v36 }
 0x389   :  { %569 = vtanh.f32 %v446_v37 }
 0x393   :  { %v570_v38 = vpop.eup %569 }
 0x394   :  { %450 = vrot.lane.b32.xlu1 %v570_v38, %s577_s0 }
 0x406   :  { %v451_v41 = vpop.permute.xlu1 %450 }
 0x407   :  { %v453_v43 = vmul.f32 %v451_v41, %v448_v40 }
 0x409   :  { %v459_v44 = vadd.f32 %v458_v42, %v453_v43 }
 0x40b   :  { %461 = vrot.lane.b32.xlu1 %v459_v44, %s577_s0 }
 0x47d   :  { %v462_v45 = vpop.permute.xlu1 %461 }
 0x47e   :  { %465 = vst.msk [vmem:[%s688_s1] sm:$0x1] %vm464_vm10, %v462_v45 }

</bundles_post_ra>
